<compile_context>
chip_gen: v5e
topology: v5e:2x2
jax: 0.10.0
libtpu: 0.0.40
codegen_flags: <defaults>
</compile_context>

<pallas_src>
import jax
import jax.numpy as jnp
from jax.experimental import pallas as pl
from jax.experimental.pallas import tpu as pltpu

ALPHA = 0.7
BETA = 0.3
GAMMA = 3.0 / 4.0
SMOOTH = 1.0

LANES = 128
SUBLANES = 8
N_CORES = 2                       # "parallel" grid axis; harmless on 1-TC chips
TILE_BYTES_PER_INPUT = 2 << 20    # ~2 MiB per input per pipeline buffer


def _cdiv(a, b):
    return (a + b - 1) // b


def _round_up(a, b):
    return _cdiv(a, b) * b


def _make_kernel(row_tile, rows, tiles_per_core, needs_mask):
    """Kernel factory: closes over static tiling parameters."""

    def kernel(x_ref, t_ref, o_ref, acc_ref):
        c = pl.program_id(0)          # core axis ("parallel")
        i = pl.program_id(1)          # tile axis ("arbitrary", reduction)

        @pl.when(i == 0)
        def _init():
            acc_ref[...] = jnp.zeros_like(acc_ref)

        x = x_ref[...].astype(jnp.float32)
        t = t_ref[...].astype(jnp.float32)

        if needs_mask:
            # Zero out rows beyond the real array: partial edge tile and/or the
            # clamped duplicate tiles on the second core. Mask BEFORE any
            # arithmetic so garbage (possibly NaN) never propagates.
            tile = c * tiles_per_core + i
            row0 = tile * row_tile
            rid = row0 + jax.lax.broadcasted_iota(jnp.int32, (row_tile, LANES), 0)
            valid = rid < rows
            x = jnp.where(valid, x, 0.0)
            t = jnp.where(valid, t, 0.0)

        # Reduce only along the (vreg-aligned) leading axis -> pure VPU adds.
        xr = x.reshape(-1, SUBLANES, LANES)
        tr = t.reshape(-1, SUBLANES, LANES)
        acc_ref[0] += jnp.sum(xr * tr, axis=0)    # partial sum of x*t
        acc_ref[1] += jnp.sum(xr, axis=0)         # partial sum of x
        acc_ref[2] += jnp.sum(tr, axis=0)         # partial sum of t

        @pl.when(i == tiles_per_core - 1)
        def _finalize():
            o_ref[0] = acc_ref[...]

    return kernel


def focal_tversky_loss(inputs, targets, smooth=SMOOTH, alpha=ALPHA,
                       beta=BETA, gamma=GAMMA, max_tile_rows=None):
    """Matches FocalTverskyLoss.forward(inputs, targets). Returns a f32 scalar."""
    x = jnp.ravel(inputs)
    t = jnp.ravel(targets)
    n = x.shape[0]

    if n == 0:
        # TP = FP = FN = 0 -> Tversky = 1 -> loss = 0
        return jnp.float32(0.0)

    # Lane padding only when numel is not a multiple of 128 (rare; zero pad is
    # sum-neutral for all three accumulated sums).
    if n % LANES:
        pad = _round_up(n, LANES) - n
        x = jnp.pad(x, (0, pad))
        t = jnp.pad(t, (0, pad))

    rows = x.shape[0] // LANES
    x2 = x.reshape(rows, LANES)
    t2 = t.reshape(rows, LANES)

    # Sublane granularity so bf16 (x16) / int8 (x32) inputs keep a legal layout.
    max_itemsize = max(x2.dtype.itemsize, t2.dtype.itemsize, 1)
    min_itemsize = max(min(x2.dtype.itemsize, t2.dtype.itemsize), 1)
    granule = max(SUBLANES, 32 // min_itemsize)

    max_rows = max(granule,
                   (TILE_BYTES_PER_INPUT // (LANES * max_itemsize)) // granule * granule)
    if max_tile_rows is not None:
        max_rows = max(granule, (max_tile_rows // granule) * granule)
    row_tile = min(max_rows, _round_up(rows, granule))

    num_tiles = _cdiv(rows, row_tile)
    n_cores = N_CORES if num_tiles >= N_CORES else 1
    tiles_per_core = _cdiv(num_tiles, n_cores)
    needs_mask = (rows % row_tile != 0) or (n_cores * tiles_per_core != num_tiles)

    def in_index_map(c, i):
        # Contiguous split across cores; clamp so no block starts out of bounds
        # (clamped duplicate tiles are fully zero-masked inside the kernel).
        return (jnp.minimum(c * tiles_per_core + i, num_tiles - 1), 0)

    tile_bytes = row_tile * LANES * (x2.dtype.itemsize + t2.dtype.itemsize)
    vmem_limit = int(min(48 << 20, max(24 << 20, 2 * tile_bytes + (8 << 20))))

    kernel = _make_kernel(row_tile, rows, tiles_per_core, needs_mask)

    partials = pl.pallas_call(
        kernel,
        out_shape=jax.ShapeDtypeStruct((n_cores, 3, SUBLANES, LANES), jnp.float32),
        grid_spec=pltpu.PrefetchScalarGridSpec(
            num_scalar_prefetch=0,
            grid=(n_cores, tiles_per_core),
            in_specs=[
                pl.BlockSpec((row_tile, LANES), in_index_map),
                pl.BlockSpec((row_tile, LANES), in_index_map),
            ],
            out_specs=pl.BlockSpec((1, 3, SUBLANES, LANES),
                                   lambda c, i: (c, 0, 0, 0)),
            scratch_shapes=[pltpu.VMEM((3, SUBLANES, LANES), jnp.float32)],
        ),
        compiler_params=pltpu.CompilerParams(
            dimension_semantics=("parallel", "arbitrary"),
            vmem_limit_bytes=vmem_limit,
        ),
    )(x2, t2)

    # Trivial final combine (a few thousand floats) + scalar Tversky/focal math.
    sums = jnp.sum(partials, axis=(0, 2, 3))   # [sum(x*t), sum(x), sum(t)]
    tp = sums[0]
    fp = sums[1] - tp
    fn = sums[2] - tp
    tversky = (tp + smooth) / (tp + alpha * fp + beta * fn + smooth)
    return (1.0 - tversky) ** gamma


def _reference(inputs, targets, smooth=SMOOTH, alpha=ALPHA, beta=BETA, gamma=GAMMA):
    x = jnp.ravel(inputs).astype(jnp.float32)
    t = jnp.ravel(targets).astype(jnp.float32)
    tp = jnp.sum(x * t)
    fp = jnp.sum((1.0 - t) * x)
    fn = jnp.sum(t * (1.0 - x))
    tversky = (tp + smooth) / (tp + alpha * fp + beta * fn + smooth)
    return (1.0 - tversky) ** gamma


def _check(inputs, targets, **kw):
    loss = focal_tversky_loss(inputs, targets, **kw)
    jax.block_until_ready(loss)
    ref = _reference(inputs, targets)
    assert jnp.allclose(loss, ref, rtol=1e-5, atol=1e-6), (loss, ref)


if __name__ == "__main__":
    key = jax.random.PRNGKey(0)
    k1, k2, k3, k4, k5, k6 = jax.random.split(key, 6)

    # Main NCHW-shaped example (the module flattens everything anyway).
    inputs = jax.nn.sigmoid(jax.random.normal(k1, (2, 4, 16, 16), dtype=jnp.float32))
    targets = (jax.random.uniform(k2, (2, 4, 16, 16)) > 0.5).astype(jnp.float32)
    _check(inputs, targets)

    # Multi-tile + dual-core + masked partial edge tile path (small max tile).
    inputs2 = jax.nn.sigmoid(jax.random.normal(k3, (2, 4, 40, 80), dtype=jnp.float32))
    targets2 = (jax.random.uniform(k4, (2, 4, 40, 80)) > 0.5).astype(jnp.float32)
    _check(inputs2, targets2, max_tile_rows=64)
    # Odd tile count -> clamped duplicate tile on core 1 (fully masked).
    _check(inputs2, targets2, max_tile_rows=72)

    # numel not a multiple of 128 -> lane-pad path.
    inputs3 = jax.nn.sigmoid(jax.random.normal(k5, (3, 5, 33), dtype=jnp.float32))
    targets3 = (jax.random.uniform(k6, (3, 5, 33)) > 0.5).astype(jnp.float32)
    _check(inputs3, targets3)

    print("KERNEL_OK")
</pallas_src>

<mosaic_0001>
module attributes {stable_mosaic.version = 11 : i64} {
  func.func @kernel(%arg0: i32, %arg1: i32, %arg2: memref<16x128xf32, #tpu.memory_space<vmem>>, %arg3: memref<16x128xf32, #tpu.memory_space<vmem>>, %arg4: memref<1x3x8x128xf32, #tpu.memory_space<vmem>>, %arg5: memref<3x8x128xf32, #tpu.memory_space<vmem>>) attributes {dimension_semantics = [#tpu.dimension_semantics<parallel>, #tpu.dimension_semantics<arbitrary>], iteration_bounds = array<i64: 1, 1>, scalar_prefetch = 0 : i64, scratch_operands = 1 : i64, tpu.core_type = #tpu.core_type<tc>, window_params = [{transform_indices = @transform_0, window_bounds = array<i64: 16, 128>}, {transform_indices = @transform_1, window_bounds = array<i64: 16, 128>}, {transform_indices = @transform_2, window_bounds = array<i64: 1, 3, 8, 128>}]} {
    %c0_i32 = arith.constant 0 : i32
    %0 = arith.cmpi eq, %arg1, %c0_i32 : i32
    %1 = arith.extui %0 : i1 to i32
    %c0_i32_0 = arith.constant 0 : i32
    %2 = arith.cmpi ne, %1, %c0_i32_0 : i32
    scf.if %2 {
      %cst_24 = arith.constant 0.000000e+00 : f32
      %32 = vector.broadcast %cst_24 : f32 to vector<3x8x128xf32>
      %c0_25 = arith.constant 0 : index
      %c0_26 = arith.constant 0 : index
      %c0_27 = arith.constant 0 : index
      %33 = vector.load %arg5[%c0_25, %c0_26, %c0_27] : memref<3x8x128xf32, #tpu.memory_space<vmem>>, vector<3x8x128xf32>
      tpu.vector_store %arg5[%c0_25, %c0_26, %c0_27], %32 {strides = array<i32>} : memref<3x8x128xf32, #tpu.memory_space<vmem>>, vector<3x8x128xf32>,
    } else {
    }
    %c0 = arith.constant 0 : index
    %c0_1 = arith.constant 0 : index
    %3 = vector.load %arg2[%c0, %c0_1] : memref<16x128xf32, #tpu.memory_space<vmem>>, vector<16x128xf32>
    %c0_2 = arith.constant 0 : index
    %c0_3 = arith.constant 0 : index
    %4 = vector.load %arg3[%c0_2, %c0_3] : memref<16x128xf32, #tpu.memory_space<vmem>>, vector<16x128xf32>
    %5 = vector.shape_cast %3 : vector<16x128xf32> to vector<2x8x128xf32>
    %6 = vector.shape_cast %4 : vector<16x128xf32> to vector<2x8x128xf32>
    %c0_4 = arith.constant 0 : index
    %c0_5 = arith.constant 0 : index
    %c0_6 = arith.constant 0 : index
    %7 = vector.load %arg5[%c0_4, %c0_5, %c0_6] : memref<3x8x128xf32, #tpu.memory_space<vmem>>, vector<1x8x128xf32>
    %8 = vector.shape_cast %7 : vector<1x8x128xf32> to vector<8x128xf32>
    %9 = arith.mulf %5, %6 : vector<2x8x128xf32>
    %cst = arith.constant dense<0.000000e+00> : vector<8x128xf32>
    %10 = vector.multi_reduction <add>, %9, %cst [0] : vector<2x8x128xf32> to vector<8x128xf32>
    %11 = arith.addf %8, %10 : vector<8x128xf32>
    %c0_7 = arith.constant 0 : index
    %c0_8 = arith.constant 0 : index
    %c0_9 = arith.constant 0 : index
    %12 = vector.load %arg5[%c0_7, %c0_8, %c0_9] : memref<3x8x128xf32, #tpu.memory_space<vmem>>, vector<1x8x128xf32>
    %13 = vector.shape_cast %12 : vector<1x8x128xf32> to vector<8x128xf32>
    %14 = vector.shape_cast %11 : vector<8x128xf32> to vector<1x8x128xf32>
    tpu.vector_store %arg5[%c0_7, %c0_8, %c0_9], %14 {strides = array<i32>} : memref<3x8x128xf32, #tpu.memory_space<vmem>>, vector<1x8x128xf32>,
    %c1 = arith.constant 1 : index
    %c0_10 = arith.constant 0 : index
    %c0_11 = arith.constant 0 : index
    %15 = vector.load %arg5[%c1, %c0_10, %c0_11] : memref<3x8x128xf32, #tpu.memory_space<vmem>>, vector<1x8x128xf32>
    %16 = vector.shape_cast %15 : vector<1x8x128xf32> to vector<8x128xf32>
    %cst_12 = arith.constant dense<0.000000e+00> : vector<8x128xf32>
    %17 = vector.multi_reduction <add>, %5, %cst_12 [0] : vector<2x8x128xf32> to vector<8x128xf32>
    %18 = arith.addf %16, %17 : vector<8x128xf32>
    %c1_13 = arith.constant 1 : index
    %c0_14 = arith.constant 0 : index
    %c0_15 = arith.constant 0 : index
    %19 = vector.load %arg5[%c1_13, %c0_14, %c0_15] : memref<3x8x128xf32, #tpu.memory_space<vmem>>, vector<1x8x128xf32>
    %20 = vector.shape_cast %19 : vector<1x8x128xf32> to vector<8x128xf32>
    %21 = vector.shape_cast %18 : vector<8x128xf32> to vector<1x8x128xf32>
    tpu.vector_store %arg5[%c1_13, %c0_14, %c0_15], %21 {strides = array<i32>} : memref<3x8x128xf32, #tpu.memory_space<vmem>>, vector<1x8x128xf32>,
    %c2 = arith.constant 2 : index
    %c0_16 = arith.constant 0 : index
    %c0_17 = arith.constant 0 : index
    %22 = vector.load %arg5[%c2, %c0_16, %c0_17] : memref<3x8x128xf32, #tpu.memory_space<vmem>>, vector<1x8x128xf32>
    %23 = vector.shape_cast %22 : vector<1x8x128xf32> to vector<8x128xf32>
    %cst_18 = arith.constant dense<0.000000e+00> : vector<8x128xf32>
    %24 = vector.multi_reduction <add>, %6, %cst_18 [0] : vector<2x8x128xf32> to vector<8x128xf32>
    %25 = arith.addf %23, %24 : vector<8x128xf32>
    %c2_19 = arith.constant 2 : index
    %c0_20 = arith.constant 0 : index
    %c0_21 = arith.constant 0 : index
    %26 = vector.load %arg5[%c2_19, %c0_20, %c0_21] : memref<3x8x128xf32, #tpu.memory_space<vmem>>, vector<1x8x128xf32>
    %27 = vector.shape_cast %26 : vector<1x8x128xf32> to vector<8x128xf32>
    %28 = vector.shape_cast %25 : vector<8x128xf32> to vector<1x8x128xf32>
    tpu.vector_store %arg5[%c2_19, %c0_20, %c0_21], %28 {strides = array<i32>} : memref<3x8x128xf32, #tpu.memory_space<vmem>>, vector<1x8x128xf32>,
    %c0_i32_22 = arith.constant 0 : i32
    %29 = arith.cmpi eq, %arg1, %c0_i32_22 : i32
    %30 = arith.extui %29 : i1 to i32
    %c0_i32_23 = arith.constant 0 : i32
    %31 = arith.cmpi ne, %30, %c0_i32_23 : i32
    scf.if %31 {
      %c0_24 = arith.constant 0 : index
      %c0_25 = arith.constant 0 : index
      %c0_26 = arith.constant 0 : index
      %32 = vector.load %arg5[%c0_24, %c0_25, %c0_26] : memref<3x8x128xf32, #tpu.memory_space<vmem>>, vector<3x8x128xf32>
      %c0_27 = arith.constant 0 : index
      %c0_28 = arith.constant 0 : index
      %c0_29 = arith.constant 0 : index
      %c0_30 = arith.constant 0 : index
      %33 = vector.load %arg4[%c0_27, %c0_28, %c0_29, %c0_30] : memref<1x3x8x128xf32, #tpu.memory_space<vmem>>, vector<1x3x8x128xf32>
      %34 = vector.shape_cast %33 : vector<1x3x8x128xf32> to vector<3x8x128xf32>
      %35 = vector.shape_cast %32 : vector<3x8x128xf32> to vector<1x3x8x128xf32>
      tpu.vector_store %arg4[%c0_27, %c0_28, %c0_29, %c0_30], %35 {strides = array<i32>} : memref<1x3x8x128xf32, #tpu.memory_space<vmem>>, vector<1x3x8x128xf32>,
    } else {
    }
    return
  }
  func.func @transform_0(%arg0: i32, %arg1: i32) -> (i32, i32) {
    %c1_i32 = arith.constant 1 : i32
    %0 = arith.muli %arg0, %c1_i32 : i32
    %1 = arith.addi %0, %arg1 : i32
    %c0_i32 = arith.constant 0 : i32
    %2 = arith.minsi %1, %c0_i32 : i32
    %c0_i32_0 = arith.constant 0 : i32
    %c0_i32_1 = arith.constant 0 : i32
    return %2, %c0_i32_0 : i32, i32
  }
  func.func @transform_1(%arg0: i32, %arg1: i32) -> (i32, i32) {
    %c1_i32 = arith.constant 1 : i32
    %0 = arith.muli %arg0, %c1_i32 : i32
    %1 = arith.addi %0, %arg1 : i32
    %c0_i32 = arith.constant 0 : i32
    %2 = arith.minsi %1, %c0_i32 : i32
    %c0_i32_0 = arith.constant 0 : i32
    %c0_i32_1 = arith.constant 0 : i32
    return %2, %c0_i32_0 : i32, i32
  }
  func.func @transform_2(%arg0: i32, %arg1: i32) -> (i32, i32, i32, i32) {
    %c0_i32 = arith.constant 0 : i32
    %c0_i32_0 = arith.constant 0 : i32
    %c0_i32_1 = arith.constant 0 : i32
    %c0_i32_2 = arith.constant 0 : i32
    return %arg0, %c0_i32, %c0_i32_0, %c0_i32_1 : i32, i32, i32, i32
  }
}

</mosaic_0001>

<bundles_post_ra>
// kernel: tpu_custom_call.1
= control target key start
LH: loop header
LB: loop body
LE: loop exit
PB: predicated region body
PF: predicated region fallthrough
CT: control target
= control target key end

     0   :  { %7 = vsyncpa [#allocation4], 0  ;;  %s245_s0 = inlined_call_operand.hbm [shape: f32[16,128], index: 0, kind: input, shape index: {}]   ;;  %s246_s1 = inlined_call_operand.hbm [shape: f32[16,128], index: 1, kind: input, shape index: {}]   ;;  %s247_s2 = inlined_call_operand.hbm [shape: f32[1,3,8,128], index: 2, kind: output, shape index: {}]  }
   0x1   :  { %8 = vsyncpa [#allocation7], 0 }
   0x2   :  { %9 = vsyncpa [#allocation5], 0  ;;  %s20_s11 = sshll.u32 %s245_s0, 4  ;;  %s207_s12 = smov [#allocation3]   ;;  %s21_s11 = int_to_ptr.hbm [resolvable:$true] %s20_s11 }
   0x3   :  { %s22_s13 = sshll.u32 %s207_s12, 4  ;;  %s39_s16 = sshll.u32 %s246_s1, 4  ;;  %s23_s13 = int_to_ptr.vmem [resolvable:$true] %s22_s13  ;;  %s40_s16 = int_to_ptr.hbm [resolvable:$true] %s39_s16 }
   0x4   :  { %s208_s17 = smov 128   ;;  %s209_s18 = smov 8  }
   0x5   :  { %28 = dma.hbm_to_vmem [thread:$0]  %s21_s11, 256, %s23_s13, [#allocation4], %s208_s17, %s208_s17, %s209_s18  }
   0x6   :  { %s210_s19 = smov [#allocation6]  }
   0x7   :  { %s41_s20 = sshll.u32 %s210_s19, 4  ;;  %s42_s20 = int_to_ptr.vmem [resolvable:$true] %s41_s20 }
   0x8   :  { %47 = dma.hbm_to_vmem [thread:$0]  %s40_s16, 256, %s42_s20, [#allocation7], %s208_s17, %s208_s17, %s209_s18  }
   0x9   :  { %201 = dma.done.wait [#allocation4], 256  }
   0xa   :  { %202 = vsyncadd [#allocation4], 4294967040 }
   0xb   :  { %203 = dma.done.wait [#allocation7], 256  }
   0xc   :  { %204 = vsyncadd [#allocation7], 4294967040  ;;  %v71_v0 = vld [vmem:[#allocation3] sm:$0xff]  ;;  %v72_v1 = vld [vmem:[#allocation3 + $0x8] sm:$0xff]  ;;  %s211_s0 = smov [#allocation8]   ;;  %s106_s23 = sshll.u32 %s247_s2, 4  ;;  %s107_s23 = int_to_ptr.hbm [resolvable:$true] %s106_s23 }
   0xd   :  { %v73_v2 = vld [vmem:[#allocation6] sm:$0xff]  ;;  %v74_v3 = vld [vmem:[#allocation6 + $0x8] sm:$0xff]  ;;  %v83_v5 = vadd.f32 %v72_v1, %v71_v0  ;;  %s104_s1 = sshll.u32 %s211_s0, 4  ;;  %s105_s1 = int_to_ptr.vmem [resolvable:$true] %s104_s1 }
   0xe   :  { %v76_v4 = vmul.f32 %v73_v2, %v71_v0  ;;  %v77_v6 = vmul.f32 %v74_v3, %v72_v1  ;;  %v88_v7 = vadd.f32 %v74_v3, %v73_v2 }
   0xf   :  { %98 = vst [vmem:[#allocation8 + $0x8] sm:$0xff] %v83_v5 }
  0x10   :  { %v78_v8 = vadd.f32 %v77_v6, %v76_v4  ;;  %99 = vst [vmem:[#allocation8 + $0x10] sm:$0xff] %v88_v7 }
  0x12   :  { %97 = vst [vmem:[#allocation8] sm:$0xff] %v78_v8 }
  0x13   :  { %112 = dma.vmem_to_hbm [thread:$0]  %s105_s1, 384, %s107_s23, [#allocation5], %s208_s17, %s208_s17, %s209_s18  }
  0x14   :  { %205 = dma.done.wait [#allocation5], 384  }
  0x15   :  { %206 = vsyncadd [#allocation5], 4294966912 }
  0x16   :  { %117 = vsyncpa [#allocation4], 1 }
  0x17   :  { %118 = vsyncpa [#allocation7], 1 }
  0x18   :  { %119 = vsyncpa [#allocation5], 1 }

</bundles_post_ra>
